<compile_context>
chip_gen: v7x
topology: tpu7x:2x2x1
jax: 0.10.0
libtpu: 0.0.40
codegen_flags: <defaults>
</compile_context>

<pallas_src>
import math

import jax
import jax.numpy as jnp
from jax.experimental import pallas as pl
from jax.experimental.pallas import tpu as pltpu

_INV_SQRT_2PI = 1.0 / math.sqrt(2.0 * math.pi)
_INV_SQRT_2 = 1.0 / math.sqrt(2.0)

_LANE = 128
# ~2 MiB per-array block: big enough to sit near the HBM roofline
# (measured ~85%+ at 512+ tiles) but small enough that 4 arrays x 2 buffers
# stays well inside v7x's 64 MiB VMEM.
_TARGET_BLOCK_BYTES = 2 * 1024 * 1024


def _cdiv(a, b):
    return -(-a // b)


def _round_up(a, b):
    return _cdiv(a, b) * b


def _relu_vp_kernel(mean_ref, var_ref, out_mean_ref, out_var_ref):
    # Compute in f32 regardless of I/O dtype (keeps exp/erf accuracy and
    # works on v5e, which has no bf16 VPU/EUP path).
    mu = mean_ref[...].astype(jnp.float32)
    var = var_ref[...].astype(jnp.float32)

    # rsqrt replaces sqrt + divide: one EUP op + two VPU multiplies instead of
    # two EUP-chain ops; the lone EUP slot already carries exp and erf.
    inv_std = jax.lax.rsqrt(var)
    std = var * inv_std                     # == sqrt(var) for var > 0
    div = mu * inv_std

    pdf = _INV_SQRT_2PI * jnp.exp(-0.5 * div * div)      # normpdf(div)
    cdf = 0.5 * (1.0 + jax.lax.erf(div * _INV_SQRT_2))   # normcdf(div)

    std_pdf = std * pdf
    out_mean = mu * cdf + std_pdf
    out_var = (mu * mu + var) * cdf + mu * std_pdf - out_mean * out_mean

    out_mean_ref[...] = out_mean.astype(out_mean_ref.dtype)
    out_var_ref[...] = out_var.astype(out_var_ref.dtype)


def _choose_tiling(n_elems, itemsize):
    """Pick (padded_rows, cols, row_tile) for a flat tensor of n_elems."""
    # Sublane quantum: 8 rows for 4-byte dtypes, 16 for 2-byte, 32 for 1-byte.
    sublane = 8 * max(1, 4 // itemsize)
    # Lane-dense columns: a large multiple of 128 (unmasked vst), but no
    # larger than the lane-padded problem itself.
    cols = min(2048, _round_up(n_elems, _LANE))
    rows_needed = _cdiv(n_elems, cols)
    # Row tile sized so one block is ~_TARGET_BLOCK_BYTES per array.
    max_rt = max(sublane,
                 (_TARGET_BLOCK_BYTES // (cols * itemsize)) // sublane * sublane)
    row_tile = min(max_rt, _round_up(rows_needed, sublane))
    # Prefer >=2 grid steps along the parallel axis so v7x's 2 TensorCores
    # both get work (harmless elsewhere).
    if rows_needed > sublane and _cdiv(rows_needed, row_tile) < 2:
        row_tile = max(sublane, _round_up(_cdiv(rows_needed, 2), sublane))
    rows = _round_up(rows_needed, row_tile)
    return rows, cols, row_tile


def relu_varprop(features_mean, features_variance, keep_variance_fn=None):
    """Pallas implementation of varprop.ReLU.forward.

    features_mean / features_variance: arrays of identical shape (e.g. NCHW).
    Returns (outputs_mean, outputs_variance) with the same shape/dtype.
    """
    assert features_mean.shape == features_variance.shape
    if keep_variance_fn is not None:
        # Same placement as the PyTorch module: applied to the input variance.
        features_variance = keep_variance_fn(features_variance)

    orig_shape = features_mean.shape
    mean_dtype = features_mean.dtype
    var_dtype = features_variance.dtype
    n = int(features_mean.size)
    itemsize = max(jnp.dtype(mean_dtype).itemsize, jnp.dtype(var_dtype).itemsize)

    rows, cols, row_tile = _choose_tiling(n, itemsize)
    padded = rows * cols

    # Flatten to a lane-dense 2D slab; pad so any NCHW shape works (no
    # divisibility requirements on the caller).
    mean_flat = features_mean.reshape(-1)
    var_flat = features_variance.reshape(-1)
    if padded != n:
        # Pad mean with 0 and variance with 1 so padded lanes stay finite.
        mean_flat = jnp.pad(mean_flat, (0, padded - n))
        var_flat = jnp.pad(var_flat, (0, padded - n), constant_values=1)
    mean2d = mean_flat.reshape(rows, cols)
    var2d = var_flat.reshape(rows, cols)

    grid = (rows // row_tile,)
    spec = pl.BlockSpec((row_tile, cols), lambda i: (i, 0))

    # VMEM budget: 2 inputs + 2 outputs, double-buffered, plus headroom.
    block_bytes = row_tile * cols * itemsize
    vmem_limit = min(max(8 * block_bytes + (4 << 20), 16 << 20), 48 << 20)

    out_mean, out_var = pl.pallas_call(
        _relu_vp_kernel,
        grid_spec=pltpu.PrefetchScalarGridSpec(
            num_scalar_prefetch=0,
            grid=grid,
            in_specs=[spec, spec],
            out_specs=[spec, spec],
        ),
        out_shape=(
            jax.ShapeDtypeStruct((rows, cols), mean_dtype),
            jax.ShapeDtypeStruct((rows, cols), var_dtype),
        ),
        compiler_params=pltpu.CompilerParams(
            dimension_semantics=("parallel",),
            vmem_limit_bytes=vmem_limit,
        ),
    )(mean2d, var2d)

    out_mean = out_mean.reshape(-1)[:n].reshape(orig_shape)
    out_var = out_var.reshape(-1)[:n].reshape(orig_shape)
    return out_mean, out_var


def _reference(mu, var):
    std = jnp.sqrt(var)
    d = mu / std
    pdf = jnp.exp(-0.5 * d * d) / jnp.sqrt(2.0 * jnp.pi)
    cdf = 0.5 * (1.0 + jax.lax.erf(d / jnp.sqrt(2.0)))
    om = mu * cdf + std * pdf
    ov = (mu * mu + var) * cdf + mu * std * pdf - om * om
    return om, ov


def _check(shape, kmu, kvar):
    mu = jax.random.normal(kmu, shape, dtype=jnp.float32)
    # Variance must be strictly positive (module assumes keep_variance_fn or
    # positive inputs; we do not alter the semantics).
    var = jax.random.uniform(kvar, shape, dtype=jnp.float32,
                             minval=0.1, maxval=1.0)
    om, ov = relu_varprop(mu, var)
    om = jax.block_until_ready(om)
    ov = jax.block_until_ready(ov)
    rm, rv = _reference(mu, var)
    assert om.shape == shape and ov.shape == shape
    assert jnp.allclose(om, rm, atol=1e-5, rtol=1e-4)
    assert jnp.allclose(ov, rv, atol=1e-5, rtol=1e-4)


if __name__ == "__main__":
    key = jax.random.PRNGKey(0)
    k0, k1, k2, k3 = jax.random.split(key, 4)

    # Shape from the module's typical NCHW usage.
    _check((2, 4, 16, 16), k0, k1)
    # Ragged spatial dims to exercise the padding path (H*W not % 128).
    _check((2, 3, 7, 7), k2, k3)

    print("KERNEL_OK")
</pallas_src>

<mosaic_0001>
module attributes {stable_mosaic.version = 11 : i64} {
  func.func @_relu_vp_kernel(%arg0: i32, %arg1: memref<8x2048xf32, #tpu.memory_space<vmem>>, %arg2: memref<8x2048xf32, #tpu.memory_space<vmem>>, %arg3: memref<8x2048xf32, #tpu.memory_space<vmem>>, %arg4: memref<8x2048xf32, #tpu.memory_space<vmem>>) attributes {dimension_semantics = [#tpu.dimension_semantics<parallel>], iteration_bounds = array<i64: 1>, scalar_prefetch = 0 : i64, scratch_operands = 0 : i64, tpu.core_type = #tpu.core_type<tc>, window_params = [{transform_indices = @transform_0, window_bounds = array<i64: 8, 2048>}, {transform_indices = @transform_1, window_bounds = array<i64: 8, 2048>}, {transform_indices = @transform_2, window_bounds = array<i64: 8, 2048>}, {transform_indices = @transform_3, window_bounds = array<i64: 8, 2048>}]} {
    %c0 = arith.constant 0 : index
    %c0_0 = arith.constant 0 : index
    %0 = vector.load %arg1[%c0, %c0_0] : memref<8x2048xf32, #tpu.memory_space<vmem>>, vector<8x2048xf32>
    %c0_1 = arith.constant 0 : index
    %c0_2 = arith.constant 0 : index
    %1 = vector.load %arg2[%c0_1, %c0_2] : memref<8x2048xf32, #tpu.memory_space<vmem>>, vector<8x2048xf32>
    %2 = math.rsqrt %1 : vector<8x2048xf32>
    %3 = arith.mulf %1, %2 : vector<8x2048xf32>
    %4 = arith.mulf %0, %2 : vector<8x2048xf32>
    %cst = arith.constant -5.000000e-01 : f32
    %5 = vector.broadcast %cst : f32 to vector<8x2048xf32>
    %6 = arith.mulf %5, %4 : vector<8x2048xf32>
    %7 = arith.mulf %6, %4 : vector<8x2048xf32>
    %8 = math.exp %7 : vector<8x2048xf32>
    %cst_3 = arith.constant 0.398942292 : f32
    %9 = vector.broadcast %cst_3 : f32 to vector<8x2048xf32>
    %10 = arith.mulf %9, %8 : vector<8x2048xf32>
    %cst_4 = arith.constant 0.707106769 : f32
    %11 = vector.broadcast %cst_4 : f32 to vector<8x2048xf32>
    %12 = arith.mulf %4, %11 : vector<8x2048xf32>
    %13 = math.erf %12 : vector<8x2048xf32>
    %cst_5 = arith.constant 1.000000e+00 : f32
    %14 = vector.broadcast %cst_5 : f32 to vector<8x2048xf32>
    %15 = arith.addf %14, %13 : vector<8x2048xf32>
    %cst_6 = arith.constant 5.000000e-01 : f32
    %16 = vector.broadcast %cst_6 : f32 to vector<8x2048xf32>
    %17 = arith.mulf %16, %15 : vector<8x2048xf32>
    %18 = arith.mulf %3, %10 : vector<8x2048xf32>
    %19 = arith.mulf %0, %17 : vector<8x2048xf32>
    %20 = arith.addf %19, %18 : vector<8x2048xf32>
    %21 = arith.mulf %0, %0 : vector<8x2048xf32>
    %22 = arith.addf %21, %1 : vector<8x2048xf32>
    %23 = arith.mulf %22, %17 : vector<8x2048xf32>
    %24 = arith.mulf %0, %18 : vector<8x2048xf32>
    %25 = arith.addf %23, %24 : vector<8x2048xf32>
    %26 = arith.mulf %20, %20 : vector<8x2048xf32>
    %27 = arith.subf %25, %26 : vector<8x2048xf32>
    %c0_7 = arith.constant 0 : index
    %c0_8 = arith.constant 0 : index
    %28 = vector.load %arg3[%c0_7, %c0_8] : memref<8x2048xf32, #tpu.memory_space<vmem>>, vector<8x2048xf32>
    tpu.vector_store %arg3[%c0_7, %c0_8], %20 {strides = array<i32>} : memref<8x2048xf32, #tpu.memory_space<vmem>>, vector<8x2048xf32>,
    %c0_9 = arith.constant 0 : index
    %c0_10 = arith.constant 0 : index
    %29 = vector.load %arg4[%c0_9, %c0_10] : memref<8x2048xf32, #tpu.memory_space<vmem>>, vector<8x2048xf32>
    tpu.vector_store %arg4[%c0_9, %c0_10], %27 {strides = array<i32>} : memref<8x2048xf32, #tpu.memory_space<vmem>>, vector<8x2048xf32>,
    return
  }
  func.func @transform_0(%arg0: i32) -> (i32, i32) {
    %c0_i32 = arith.constant 0 : i32
    %c0_i32_0 = arith.constant 0 : i32
    return %arg0, %c0_i32 : i32, i32
  }
  func.func @transform_1(%arg0: i32) -> (i32, i32) {
    %c0_i32 = arith.constant 0 : i32
    %c0_i32_0 = arith.constant 0 : i32
    return %arg0, %c0_i32 : i32, i32
  }
  func.func @transform_2(%arg0: i32) -> (i32, i32) {
    %c0_i32 = arith.constant 0 : i32
    %c0_i32_0 = arith.constant 0 : i32
    return %arg0, %c0_i32 : i32, i32
  }
  func.func @transform_3(%arg0: i32) -> (i32, i32) {
    %c0_i32 = arith.constant 0 : i32
    %c0_i32_0 = arith.constant 0 : i32
    return %arg0, %c0_i32 : i32, i32
  }
}

</mosaic_0001>

<bundles_post_ra>
// kernel: tpu_custom_call.1
= control target key start
LH: loop header
LB: loop body
LE: loop exit
PB: predicated region body
PF: predicated region fallthrough
CT: control target
= control target key end

     0   :  { %9 = vsyncpa [#allocation3], 0  ;;  %s1221_s0 = inlined_call_operand.hbm [shape: f32[8,2048], index: 0, kind: input, shape index: {}]   ;;  %s1222_s1 = inlined_call_operand.hbm [shape: f32[8,2048], index: 1, kind: input, shape index: {}]   ;;  %s1223_s2 = inlined_call_operand.hbm [shape: f32[8,2048], index: 2, kind: output, shape index: {0}]   ;;  %s1224_s3 = inlined_call_operand.hbm [shape: f32[8,2048], index: 3, kind: output, shape index: {1}]  }
   0x1   :  { %10 = vsyncpa [#allocation6], 0 }
   0x2   :  { %11 = vsyncpa [#allocation4], 0 }
   0x3   :  { %12 = vsyncpa [#allocation9], 0  ;;  %s681_s12 = smov [#allocation2]   ;;  %s682_s14 = smov [#allocation5]  }
   0x4   :  { %s19_s13 = sshll.u32 %s681_s12, 4  ;;  %s29_s15 = sshll.u32 %s682_s14, 4  ;;  %s20_s13 = int_to_ptr.vmem [resolvable:$true] %s19_s13  ;;  %s30_s15 = int_to_ptr.vmem [resolvable:$true] %s29_s15 }
   0x5   :  { %s585_s18 = scalar_lea.hbm %s1221_s0, 2048 }
   0x6   :  { %p586_p0 = scmp.ne.s32.totalorder %s1221_s0, %s585_s18  ;;  %p589_p1 = scmp.lt.u32.totalorder %s585_s18, %s1221_s0 }
   0x8   :  { %p591_p2 = pnand %p589_p1, %p586_p0 }
   0xa   :  { %594 = shalt.err (!%p591_p2)
}
   0xb   :  { %s595_s23 = scalar_lea.vmem %s20_s13, 2048  ;;  %p600_p4 = scmp.lt.s32.totalorder %s20_s13, %s20_s13 }
   0xc   :  { %p596_p3 = scmp.ne.s32.totalorder %s20_s13, %s595_s23  ;;  %p601_p5 = scmp.lt.s32.totalorder %s595_s23, %s595_s23 }
   0xe   :  { %p602_p6 = por %p601_p5, %p600_p4 }
  0x10   :  { %p603_p7 = pnand %p602_p6, %p596_p3 }
  0x12   :  { %606 = shalt.err (!%p603_p7)
}
  0x13   :  { %22 = dma.hbm_to_vmem [thread:$0]  %s1221_s0, 2048, %s20_s13, [#allocation3]  }
  0x14   :  { %s607_s28 = scalar_lea.hbm %s1222_s1, 2048 }
  0x15   :  { %p608_p8 = scmp.ne.s32.totalorder %s1222_s1, %s607_s28  ;;  %p611_p9 = scmp.lt.u32.totalorder %s607_s28, %s1222_s1 }
  0x17   :  { %p613_p10 = pnand %p611_p9, %p608_p8 }
  0x19   :  { %616 = shalt.err (!%p613_p10)
}
  0x1a   :  { %s617_s6 = scalar_lea.vmem %s30_s15, 2048  ;;  %p622_p12 = scmp.lt.s32.totalorder %s30_s15, %s30_s15 }
  0x1b   :  { %p618_p11 = scmp.ne.s32.totalorder %s30_s15, %s617_s6  ;;  %p623_p13 = scmp.lt.s32.totalorder %s617_s6, %s617_s6 }
  0x1d   :  { %p624_p0 = por %p623_p13, %p622_p12 }
  0x1f   :  { %p625_p1 = pnand %p624_p0, %p618_p11 }
  0x21   :  { %628 = shalt.err (!%p625_p1)
}
  0x22   :  { %32 = dma.hbm_to_vmem [thread:$0]  %s1222_s1, 2048, %s30_s15, [#allocation6]  }
  0x23   :  { %673 = dma.done.wait [#allocation3], 2048  }
  0x24   :  { %674 = vsyncadd [#allocation3], 4294965248 }
  0x25   :  { %675 = dma.done.wait [#allocation6], 2048  }
  0x26   :  { %676 = vsyncadd [#allocation6], 4294965248  ;;  %v729_v0 = vld [vmem:[#allocation2] sm:$0xff]  ;;  %v733_v2 = vld [vmem:[#allocation2 + $0x8] sm:$0xff]  ;;  %s683_s1 = smov [#allocation7]   ;;  %s684_s9 = smov [#allocation8]  }
  0x27   :  { %v731_v1 = vld [vmem:[#allocation5] sm:$0xff]  ;;  %v736_v3 = vld [vmem:[#allocation5 + $0x8] sm:$0xff]  ;;  %v738_v4 = vld [vmem:[#allocation2 + $0x10] sm:$0xff]  ;;  %v311_v6 = vmul.f32 %v729_v0, %v729_v0  ;;  %v312_v7 = vmul.f32 %v733_v2, %v733_v2  ;;  %s461_s8 = sshll.u32 %s683_s1, 4  ;;  %s471_s10 = sshll.u32 %s684_s9, 4  ;;  %s462_s8 = int_to_ptr.vmem [resolvable:$true] %s461_s8  ;;  %s472_s10 = int_to_ptr.vmem [resolvable:$true] %s471_s10 }
  0x28   :  { %489 = vrsqrt.f32 %v731_v1  ;;  %v740_v5 = vld [vmem:[#allocation5 + $0x10] sm:$0xff]  ;;  %v747_v8 = vld [vmem:[#allocation2 + $0x18] sm:$0xff]  ;;  %v751_v10 = vld [vmem:[#allocation2 + $0x20] sm:$0xff]  ;;  %v313_v11 = vmul.f32 %v738_v4, %v738_v4  ;;  %s629_s11 = scalar_lea.vmem %s462_s8, 2048  ;;  %p634_p3 = scmp.lt.s32.totalorder %s462_s8, %s462_s8 }
  0x29   :  { %491 = vrsqrt.f32 %v736_v3  ;;  %v749_v9 = vld [vmem:[#allocation5 + $0x18] sm:$0xff]  ;;  %1234 = vst [vmem:[#allocation14_spill] sm:$0xff] %v751_v10  ;;  %v756_v12 = vld [vmem:[#allocation5 + $0x20] sm:$0xff]  ;;  %v758_v13 = vld [vmem:[#allocation2 + $0x28] sm:$0xff]  ;;  %v763_v15 = vadd.f32 %v311_v6, %v731_v1  ;;  %v766_v16 = vadd.f32 %v312_v7, %v736_v3  ;;  %v314_v17 = vmul.f32 %v747_v8, %v747_v8  ;;  %p630_p2 = scmp.ne.s32.totalorder %s462_s8, %s629_s11  ;;  %p635_p4 = scmp.lt.s32.totalorder %s629_s11, %s629_s11 }
  0x2a   :  { %493 = vrsqrt.f32 %v740_v5  ;;  %1235 = vst [vmem:[#allocation15_spill] sm:$0xff] %v758_v13  ;;  %v760_v14 = vld [vmem:[#allocation5 + $0x28] sm:$0xff]  ;;  %v771_v18 = vld [vmem:[#allocation2 + $0x30] sm:$0xff]  ;;  %v775_v20 = vld [vmem:[#allocation2 + $0x38] sm:$0xff]  ;;  %v778_v21 = vadd.f32 %v313_v11, %v740_v5  ;;  %v315_v22 = vmul.f32 %v751_v10, %v751_v10  ;;  %v316_v23 = vmul.f32 %v758_v13, %v758_v13 }
  0x2b   :  { %495 = vrsqrt.f32 %v749_v9  ;;  %v773_v19 = vld [vmem:[#allocation5 + $0x30] sm:$0xff]  ;;  %v785_v24 = vld [vmem:[#allocation5 + $0x38] sm:$0xff]  ;;  %v787_v25 = vld [vmem:[#allocation2 + $0x40] sm:$0xff]  ;;  %v790_v26 = vadd.f32 %v314_v17, %v749_v9  ;;  %v317_v27 = vmul.f32 %v771_v18, %v771_v18  ;;  %v318_v28 = vmul.f32 %v775_v20, %v775_v20  ;;  %p636_p5 = por %p635_p4, %p634_p3 }
  0x2c   :  { %497 = vrsqrt.f32 %v756_v12  ;;  %v797_v29 = vld [vmem:[#allocation5 + $0x40] sm:$0xff]  ;;  %v799_v30 = vld [vmem:[#allocation2 + $0x48] sm:$0xff]  ;;  %v802_v31 = vadd.f32 %v315_v22, %v756_v12  ;;  %v805_v32 = vadd.f32 %v316_v23, %v760_v14  ;;  %v319_v33 = vmul.f32 %v787_v25, %v787_v25  ;;  %v812_v35 = vld [vmem:[#allocation2 + $0x50] sm:$0xff] }
  0x2d   :  { %499 = vrsqrt.f32 %v760_v14  ;;  %v810_v34 = vld [vmem:[#allocation5 + $0x48] sm:$0xff]  ;;  %v814_v36 = vld [vmem:[#allocation2 + $0x58] sm:$0xff]  ;;  %v817_v37 = vadd.f32 %v317_v27, %v773_v19  ;;  %v820_v38 = vadd.f32 %v318_v28, %v785_v24  ;;  %v320_v39 = vmul.f32 %v799_v30, %v799_v30  ;;  %v825_v40 = vld [vmem:[#allocation5 + $0x50] sm:$0xff]  ;;  %p637_p6 = pnand %p636_p5, %p630_p2 }
  0x2e   :  { %1236 = vst [vmem:[#allocation16_spill] sm:$0xff] %v805_v32  ;;  %501 = vrsqrt.f32 %v773_v19  ;;  %v827_v41 = vld [vmem:[#allocation2 + $0x60] sm:$0xff]  ;;  %v829_v42 = vld [vmem:[#allocation2 + $0x68] sm:$0xff]  ;;  %v832_v43 = vadd.f32 %v319_v33, %v797_v29  ;;  %v321_v44 = vmul.f32 %v812_v35, %v812_v35  ;;  %v322_v45 = vmul.f32 %v814_v36, %v814_v36  ;;  %v839_v46 = vld [vmem:[#allocation5 + $0x58] sm:$0xff] }
  0x2f   :  { %1237 = vst [vmem:[#allocation17_spill] sm:$0xff] %v817_v37  ;;  %1238 = vst [vmem:[#allocation18_spill] sm:$0xff] %v820_v38  ;;  %503 = vrsqrt.f32 %v785_v24  ;;  %v841_v47 = vld [vmem:[#allocation2 + $0x70] sm:$0xff]  ;;  %v844_v48 = vadd.f32 %v320_v39, %v810_v34  ;;  %v323_v49 = vmul.f32 %v827_v41, %v827_v41  ;;  %v324_v50 = vmul.f32 %v829_v42, %v829_v42  ;;  %v851_v51 = vld [vmem:[#allocation5 + $0x60] sm:$0xff] }
  0x30   :  { %1239 = vst [vmem:[#allocation19_spill] sm:$0xff] %v829_v42  ;;  %1240 = vst [vmem:[#allocation20_spill] sm:$0xff] %v832_v43  ;;  %505 = vrsqrt.f32 %v797_v29  ;;  %v853_v52 = vld [vmem:[#allocation5 + $0x68] sm:$0xff]  ;;  %v855_v53 = vld [vmem:[#allocation2 + $0x78] sm:$0xff]  ;;  %v858_v54 = vadd.f32 %v321_v44, %v825_v40  ;;  %v861_v55 = vadd.f32 %v322_v45, %v839_v46  ;;  %v325_v56 = vmul.f32 %v841_v47, %v841_v47 }
  0x31   :  { %1241 = vst [vmem:[#allocation21_spill] sm:$0xff] %v841_v47  ;;  %1242 = vst [vmem:[#allocation22_spill] sm:$0xff] %v844_v48  ;;  %507 = vrsqrt.f32 %v810_v34  ;;  %v866_v58 = vld [vmem:[#allocation5 + $0x70] sm:$0xff]  ;;  %v869_v59 = vadd.f32 %v323_v49, %v851_v51  ;;  %v872_v60 = vadd.f32 %v324_v50, %v853_v52  ;;  %v326_v61 = vmul.f32 %v855_v53, %v855_v53  ;;  %v881_v7 = vld [vmem:[#allocation5 + $0x78] sm:$0xff] }
  0x32   :  { %1243 = vst [vmem:[#allocation23_spill] sm:$0xff] %v855_v53  ;;  %1244 = vst [vmem:[#allocation24_spill] sm:$0xff] %v858_v54  ;;  %v490_v57 = vpop.eup %489  ;;  %509 = vrsqrt.f32 %v825_v40  ;;  %v884_v11 = vadd.f32 %v325_v56, %v866_v58 }
  0x33   :  { %1245 = vst [vmem:[#allocation25_spill] sm:$0xff] %v861_v55  ;;  %1246 = vst [vmem:[#allocation26_spill] sm:$0xff] %v869_v59  ;;  %v492_v62 = vpop.eup %491  ;;  %v877_v63 = vmul.f32 %v490_v57, %v731_v1  ;;  %v103_v6 = vmul.f32 %v490_v57, %v729_v0  ;;  %511 = vrsqrt.f32 %v839_v46  ;;  %v892_v1 = vadd.f32 %v326_v61, %v881_v7 }
  0x34   :  { %1247 = vst [vmem:[#allocation27_spill] sm:$0xff] %v872_v60  ;;  %1248 = vst [vmem:[#allocation28_spill] sm:$0xff] %v884_v11  ;;  %v494_v17 = vpop.eup %493  ;;  %v887_v22 = vmul.f32 %v492_v62, %v736_v3  ;;  %v104_v23 = vmul.f32 %v492_v62, %v733_v2  ;;  %513 = vrsqrt.f32 %v851_v51 }
  0x35   :  { %1249 = vst [vmem:[#allocation29_spill] sm:$0xff] %v892_v1  ;;  %v496_v27 = vpop.eup %495  ;;  %v119_v28 = vmul.f32 -0.5, %v103_v6  ;;  %v199_v33 = vmul.f32 0.70710677, %v103_v6  ;;  %v895_v39 = vmul.f32 %v494_v17, %v740_v5  ;;  %v105_v44 = vmul.f32 %v494_v17, %v738_v4 }
  0x36   :  { %v498_v45 = vpop.eup %497  ;;  %v120_v49 = vmul.f32 -0.5, %v104_v23  ;;  %v200_v50 = vmul.f32 0.70710677, %v104_v23  ;;  %v899_v3 = vmul.f32 %v496_v27, %v749_v9  ;;  %v106_v56 = vmul.f32 %v496_v27, %v747_v8 }
  0x37   :  { %v500_v57 = vpop.eup %499  ;;  %v135_v62 = vmul.f32 %v119_v28, %v103_v6  ;;  %515 = verf.f32 %v199_v33  ;;  %v121_v61 = vmul.f32 -0.5, %v105_v44  ;;  %v201_v1 = vmul.f32 0.70710677, %v105_v44 }
  0x38   :  { %v502_v11 = vpop.eup %501  ;;  %v136_v60 = vmul.f32 %v120_v49, %v104_v23  ;;  %517 = verf.f32 %v200_v50  ;;  %v122_v5 = vmul.f32 -0.5, %v106_v56  ;;  %v202_v59 = vmul.f32 0.70710677, %v106_v56 }
  0x39   :  { %v504_v55 = vpop.eup %503  ;;  %v151_v17 = vmul.f32 1.442695, %v135_v62  ;;  %v137_v54 = vmul.f32 %v121_v61, %v105_v44  ;;  %519 = verf.f32 %v201_v1  ;;  %v903_v48 = vmul.f32 %v498_v45, %v756_v12 }
  0x3a   :  { %v506_v9 = vpop.eup %505  ;;  %v153_v43 = vmul.f32 1.442695, %v136_v60  ;;  %v138_v27 = vmul.f32 %v122_v5, %v106_v56  ;;  %521 = verf.f32 %v202_v59  ;;  %v107_v6 = vmul.f32 %v498_v45, %v751_v10 }
  0x3b   :  { %v906_v28 = vpop.eup %507  ;;  %523 = vpow2.f32 %v151_v17  ;;  %v155_v23 = vmul.f32 1.442695, %v137_v54  ;;  %v909_v33 = vmul.f32 %v500_v57, %v760_v14  ;;  %v108_v49 = vmul.f32 %v500_v57, %v758_v13 }
  0x3c   :  { %v912_v44 = vpop.eup %509  ;;  %525 = vpow2.f32 %v153_v43  ;;  %v157_v12 = vmul.f32 1.442695, %v138_v27  ;;  %v123_v1 = vmul.f32 -0.5, %v107_v6  ;;  %v203_v50 = vmul.f32 0.70710677, %v107_v6 }
  0x3d   :  { %v914_v60 = vpop.eup %511  ;;  %527 = vpow2.f32 %v155_v23  ;;  %v124_v59 = vmul.f32 -0.5, %v108_v49  ;;  %v204_v45 = vmul.f32 0.70710677, %v108_v49  ;;  %v917_v56 = vmul.f32 %v502_v11, %v773_v19 }
  0x3e   :  { %v919_v54 = vpop.eup %513  ;;  %529 = vpow2.f32 %v157_v12  ;;  %v139_v14 = vmul.f32 %v123_v1, %v107_v6  ;;  %v109_v57 = vmul.f32 %v502_v11, %v771_v18  ;;  %v923_v62 = vmul.f32 %v504_v55, %v785_v24 }
  0x3f   :  { %531 = verf.f32 %v203_v50  ;;  %v140_v43 = vmul.f32 %v124_v59, %v108_v49  ;;  %v110_v61 = vmul.f32 %v504_v55, %v775_v20  ;;  %v927_v5 = vmul.f32 %v506_v9, %v797_v29 }
  0x40   :  { %v159_v17 = vmul.f32 1.442695, %v139_v14  ;;  %533 = verf.f32 %v204_v45  ;;  %v125_v19 = vmul.f32 -0.5, %v109_v57  ;;  %v205_v27 = vmul.f32 0.70710677, %v109_v57 }
  0x41   :  { %v516_v23 = vpop.eup %515  ;;  %v161_v38 = vmul.f32 1.442695, %v140_v43  ;;  %v126_v12 = vmul.f32 -0.5, %v110_v61  ;;  %v206_v6 = vmul.f32 0.70710677, %v110_v61  ;;  %v111_v11 = vmul.f32 %v506_v9, %v787_v25 }
  0x42   :  { %v518_v1 = vpop.eup %517  ;;  %v231_v24 = vadd.f32 1.0, %v516_v23  ;;  %535 = vpow2.f32 %v159_v17  ;;  %v141_v50 = vmul.f32 %v125_v19, %v109_v57  ;;  %v932_v55 = vmul.f32 %v906_v28, %v810_v34 }
  0x43   :  { %v520_v29 = vpop.eup %519  ;;  %v232_v49 = vadd.f32 1.0, %v518_v1  ;;  %537 = vpow2.f32 %v161_v38  ;;  %v142_v59 = vmul.f32 %v126_v12, %v110_v61  ;;  %v127_v45 = vmul.f32 -0.5, %v111_v11 }
  0x44   :  { %v522_v14 = vpop.eup %521  ;;  %v934_v37 = vmul.f32 0.5, %v231_v24  ;;  %v233_v43 = vadd.f32 1.0, %v520_v29  ;;  %v163_v32 = vmul.f32 1.442695, %v141_v50  ;;  %539 = verf.f32 %v205_v27 }
  0x45   :  { %v524_v9 = vpop.eup %523  ;;  %v936_v53 = vmul.f32 0.5, %v232_v49  ;;  %v234_v17 = vadd.f32 1.0, %v522_v14  ;;  %v165_v57 = vmul.f32 1.442695, %v142_v59  ;;  %541 = verf.f32 %v206_v6 }
  0x46   :  { %v526_v19 = vpop.eup %525  ;;  %v183_v34 = vmul.f32 0.3989423, %v524_v9  ;;  %v279_v23 = vmul.f32 %v934_v37, %v729_v0  ;;  %v940_v38 = vmul.f32 0.5, %v233_v43  ;;  %543 = vpow2.f32 %v163_v32 }
  0x47   :  { %v528_v61 = vpop.eup %527  ;;  %v184_v12 = vmul.f32 0.3989423, %v526_v19  ;;  %v280_v1 = vmul.f32 %v936_v53, %v733_v2  ;;  %v944_v27 = vmul.f32 0.5, %v234_v17  ;;  %545 = vpow2.f32 %v165_v57 }
  0x48   :  { %v530_v24 = vpop.eup %529  ;;  %v947_v50 = vmul.f32 %v183_v34, %v877_v63  ;;  %v185_v6 = vmul.f32 0.3989423, %v528_v61  ;;  %v281_v29 = vmul.f32 %v940_v38, %v738_v4  ;;  %v143_v49 = vmul.f32 %v127_v45, %v111_v11 }
  0x49   :  { %v532_v59 = vpop.eup %531  ;;  %v952_v32 = vmul.f32 %v184_v12, %v887_v22  ;;  %v186_v14 = vmul.f32 0.3989423, %v530_v24  ;;  %v282_v43 = vmul.f32 %v944_v27, %v747_v8  ;;  %v207_v9 = vmul.f32 0.70710677, %v111_v11 }
  0x4a   :  { %v534_v17 = vpop.eup %533  ;;  %v957_v57 = vadd.f32 %v279_v23, %v947_v50  ;;  %v960_v63 = vmul.f32 %v185_v6, %v895_v39  ;;  %v235_v19 = vadd.f32 1.0, %v532_v59  ;;  %v167_v34 = vmul.f32 1.442695, %v143_v49 }
  0x4b   :  { %v963_v45 = vadd.f32 %v280_v1, %v952_v32  ;;  %v966_v22 = vmul.f32 %v186_v14, %v899_v3  ;;  %v236_v61 = vadd.f32 1.0, %v534_v17  ;;  %547 = verf.f32 %v207_v9 }
  0x4c   :  { %v536_v12 = vpop.eup %535  ;;  %423 = vst [vmem:[#allocation7] sm:$0xff] %v957_v57  ;;  %v970_v11 = vadd.f32 %v281_v29, %v960_v63  ;;  %v972_v23 = vmul.f32 0.5, %v235_v19  ;;  %549 = vpow2.f32 %v167_v34  ;;  %v112_v39 = vmul.f32 %v906_v28, %v799_v30 }
  0x4d   :  { %v538_v24 = vpop.eup %537  ;;  %424 = vst [vmem:[#allocation7 + $0x8] sm:$0xff] %v963_v45  ;;  %v978_v3 = vadd.f32 %v282_v43, %v966_v22  ;;  %v187_v1 = vmul.f32 0.3989423, %v536_v12  ;;  %v980_v6 = vmul.f32 0.5, %v236_v61  ;;  %v984_v49 = vmul.f32 %v912_v44, %v825_v40 }
  0x4e   :  { %v540_v29 = vpop.eup %539  ;;  %425 = vst [vmem:[#allocation7 + $0x10] sm:$0xff] %v970_v11  ;;  %v283_v59 = vmul.f32 %v972_v23, %v751_v10  ;;  %v188_v28 = vmul.f32 0.3989423, %v538_v24  ;;  %v128_v14 = vmul.f32 -0.5, %v112_v39  ;;  %v208_v9 = vmul.f32 0.70710677, %v112_v39 }
  0x4f   :  { %1250 = vst [vmem:[#allocation30_spill] sm:$0xff] %v980_v6  ;;  %1251 = vst [vmem:[#allocation31_spill] sm:$0xff] %v984_v49  ;;  %v542_v17 = vpop.eup %541  ;;  %v991_v43 = vmul.f32 %v187_v1, %v903_v48  ;;  %v284_v19 = vmul.f32 %v980_v6, %v758_v13  ;;  %v237_v40 = vadd.f32 1.0, %v540_v29  ;;  %v113_v34 = vmul.f32 %v912_v44, %v812_v35 }
  0x50   :  { %426 = vst [vmem:[#allocation7 + $0x18] sm:$0xff] %v978_v3  ;;  %v544_v61 = vpop.eup %543  ;;  %v998_v12 = vmul.f32 %v188_v28, %v909_v33  ;;  %v238_v24 = vadd.f32 1.0, %v542_v17  ;;  %v144_v47 = vmul.f32 %v128_v14, %v112_v39  ;;  %551 = verf.f32 %v208_v9 }
  0x51   :  { %v546_v10 = vpop.eup %545  ;;  %v1001_v49 = vadd.f32 %v283_v59, %v991_v43  ;;  %v189_v48 = vmul.f32 0.3989423, %v544_v61  ;;  %v1003_v1 = vmul.f32 0.5, %v237_v40  ;;  %v129_v42 = vmul.f32 -0.5, %v113_v34 }
  0x52   :  { %v1006_v29 = vadd.f32 %v284_v19, %v998_v12  ;;  %v190_v13 = vmul.f32 0.3989423, %v546_v10  ;;  %v1008_v44 = vmul.f32 0.5, %v238_v24  ;;  %v169_v6 = vmul.f32 1.442695, %v144_v47 }
  0x53   :  { %427 = vst [vmem:[#allocation7 + $0x20] sm:$0xff] %v1001_v49  ;;  %v1012_v33 = vmul.f32 %v189_v48, %v917_v56  ;;  %v285_v39 = vmul.f32 %v1003_v1, %v771_v18  ;;  %v145_v59 = vmul.f32 %v129_v42, %v113_v34  ;;  %v209_v28 = vmul.f32 0.70710677, %v113_v34 }
  0x54   :  { %428 = vst [vmem:[#allocation7 + $0x28] sm:$0xff] %v1006_v29  ;;  %v1018_v14 = vmul.f32 %v190_v13, %v923_v62  ;;  %v286_v10 = vmul.f32 %v1008_v44, %v775_v20  ;;  %553 = vpow2.f32 %v169_v6  ;;  %v1024_v47 = vmul.f32 %v914_v60, %v839_v46 }
  0x55   :  { %v548_v56 = vpop.eup %547  ;;  %v1027_v9 = vadd.f32 %v285_v39, %v1012_v33  ;;  %v171_v17 = vmul.f32 1.442695, %v145_v59  ;;  %555 = verf.f32 %v209_v28  ;;  %v114_v42 = vmul.f32 %v914_v60, %v814_v36 }
  0x56   :  { %v550_v19 = vpop.eup %549  ;;  %v1032_v13 = vadd.f32 %v286_v10, %v1018_v14  ;;  %v239_v62 = vadd.f32 1.0, %v548_v56  ;;  %v1036_v6 = vmul.f32 %v919_v54, %v851_v51  ;;  %v115_v46 = vmul.f32 %v919_v54, %v827_v41 }
  0x57   :  { %429 = vst [vmem:[#allocation7 + $0x30] sm:$0xff] %v1027_v9  ;;  %v191_v40 = vmul.f32 0.3989423, %v550_v19  ;;  %557 = vpow2.f32 %v171_v17  ;;  %v130_v34 = vmul.f32 -0.5, %v114_v42  ;;  %v210_v61 = vmul.f32 0.70710677, %v114_v42 }
  0x58   :  { %430 = vst [vmem:[#allocation7 + $0x38] sm:$0xff] %v1032_v13  ;;  %v1042_v60 = vmul.f32 0.5, %v239_v62  ;;  %v131_v24 = vmul.f32 -0.5, %v115_v46  ;;  %v211_v48 = vmul.f32 0.70710677, %v115_v46  ;;  %559 = vrsqrt.f32 %v853_v52 }
  0x59   :  { %v1046_v51 = vmul.f32 %v191_v40, %v927_v5  ;;  %v146_v39 = vmul.f32 %v130_v34, %v114_v42  ;;  %561 = verf.f32 %v210_v61  ;;  %v343_v54 = vmul.f32 %v763_v15, %v934_v37 }
  0x5a   :  { %v552_v59 = vpop.eup %551  ;;  %v287_v28 = vmul.f32 %v1042_v60, %v787_v25  ;;  %v147_v10 = vmul.f32 %v131_v24, %v115_v46  ;;  %563 = verf.f32 %v211_v48  ;;  %v359_v56 = vmul.f32 %v947_v50, %v729_v0 }
  0x5b   :  { %v240_v17 = vadd.f32 1.0, %v552_v59  ;;  %v173_v19 = vmul.f32 1.442695, %v146_v39  ;;  %565 = vrsqrt.f32 %v866_v58  ;;  %v391_v5 = vmul.f32 %v957_v57, %v957_v57 }
  0x5c   :  { %v1058_v42 = vadd.f32 %v287_v28, %v1046_v51  ;;  %v175_v15 = vmul.f32 1.442695, %v147_v10  ;;  %567 = vrsqrt.f32 %v881_v7  ;;  %v375_v37 = vadd.f32 %v359_v56, %v343_v54 }
  0x5d   :  { %v1061_v62 = vmul.f32 0.5, %v240_v17  ;;  %569 = vpow2.f32 %v173_v19  ;;  %v344_v0 = vmul.f32 %v766_v16, %v936_v53  ;;  %v360_v50 = vmul.f32 %v952_v32, %v733_v2  ;;  %v1253_v19 = vld [vmem:[#allocation31_spill] sm:$0xff] }
  0x5e   :  { %v554_v46 = vpop.eup %553  ;;  %431 = vst [vmem:[#allocation7 + $0x40] sm:$0xff] %v1058_v42  ;;  %571 = vpow2.f32 %v175_v15  ;;  %v407_v57 = vsub.f32 %v375_v37, %v391_v5  ;;  %v392_v40 = vmul.f32 %v963_v45, %v963_v45  ;;  %v345_v34 = vmul.f32 %v778_v21, %v940_v38 }
  0x5f   :  { %v556_v61 = vpop.eup %555  ;;  %v192_v24 = vmul.f32 0.3989423, %v554_v46  ;;  %v288_v48 = vmul.f32 %v1061_v62, %v799_v30  ;;  %v376_v16 = vadd.f32 %v360_v50, %v344_v0  ;;  %v361_v2 = vmul.f32 %v960_v63, %v738_v4  ;;  %v1254_v46 = vld [vmem:[#allocation14_spill] sm:$0xff] }
  0x60   :  { %v241_v53 = vadd.f32 1.0, %v556_v61  ;;  %439 = vst [vmem:[#allocation8] sm:$0xff] %v407_v57  ;;  %v393_v32 = vmul.f32 %v970_v11, %v970_v11  ;;  %v346_v45 = vmul.f32 %v790_v26, %v944_v27  ;;  %v362_v21 = vmul.f32 %v966_v22, %v747_v8  ;;  %v1252_v22 = vld [vmem:[#allocation19_spill] sm:$0xff] }
  0x61   :  { %v558_v38 = vpop.eup %557  ;;  %v1083_v39 = vmul.f32 %v192_v24, %v932_v55  ;;  %v408_v54 = vsub.f32 %v376_v16, %v392_v40  ;;  %v377_v59 = vadd.f32 %v361_v2, %v345_v34  ;;  %v394_v4 = vmul.f32 %v978_v3, %v978_v3 }
  0x62   :  { %v560_v63 = vpop.eup %559  ;;  %v193_v28 = vmul.f32 0.3989423, %v558_v38  ;;  %v1087_v10 = vmul.f32 0.5, %v241_v53  ;;  %v378_v11 = vadd.f32 %v362_v21, %v346_v45  ;;  %v347_v26 = vmul.f32 %v802_v31, %v972_v23 }
  0x63   :  { %v562_v27 = vpop.eup %561  ;;  %v1092_v8 = vadd.f32 %v288_v48, %v1083_v39  ;;  %v1095_v55 = vmul.f32 %v560_v63, %v853_v52  ;;  %v116_v56 = vmul.f32 %v560_v63, %v1252_v22  ;;  %440 = vst [vmem:[#allocation8 + $0x8] sm:$0xff] %v408_v54  ;;  %v409_v17 = vsub.f32 %v377_v59, %v393_v32  ;;  %v1255_v48 = vld [vmem:[#allocation21_spill] sm:$0xff] }
  0x64   :  { %v564_v3 = vpop.eup %563  ;;  %v1099_v5 = vmul.f32 %v193_v28, %v1253_v19  ;;  %v289_v15 = vmul.f32 %v1087_v10, %v812_v35  ;;  %v242_v37 = vadd.f32 1.0, %v562_v27  ;;  %v410_v31 = vsub.f32 %v378_v11, %v394_v4  ;;  %v1256_v28 = vld [vmem:[#allocation23_spill] sm:$0xff] }
  0x65   :  { %v566_v23 = vpop.eup %565  ;;  %432 = vst [vmem:[#allocation7 + $0x48] sm:$0xff] %v1092_v8  ;;  %v243_v0 = vadd.f32 1.0, %v564_v3  ;;  %v132_v50 = vmul.f32 -0.5, %v116_v56  ;;  %v212_v52 = vmul.f32 0.70710677, %v116_v56  ;;  %441 = vst [vmem:[#allocation8 + $0x10] sm:$0xff] %v409_v17  ;;  %v363_v57 = vmul.f32 %v991_v43, %v1254_v46 }
  0x66   :  { %v568_v40 = vpop.eup %567  ;;  %v1107_v34 = vadd.f32 %v289_v15, %v1099_v5  ;;  %v1109_v61 = vmul.f32 0.5, %v242_v37  ;;  %v1112_v24 = vmul.f32 %v566_v23, %v866_v58  ;;  %v117_v16 = vmul.f32 %v566_v23, %v1255_v48  ;;  %442 = vst [vmem:[#allocation8 + $0x18] sm:$0xff] %v410_v31  ;;  %v1257_v23 = vld [vmem:[#allocation30_spill] sm:$0xff] }
  0x67   :  { %v570_v2 = vpop.eup %569  ;;  %v1115_v53 = vmul.f32 0.5, %v243_v0  ;;  %v148_v32 = vmul.f32 %v132_v50, %v116_v56  ;;  %573 = verf.f32 %v212_v52  ;;  %v1118_v45 = vmul.f32 %v568_v40, %v881_v7  ;;  %v1258_v0 = vld [vmem:[#allocation16_spill] sm:$0xff] }
  0x68   :  { %v572_v43 = vpop.eup %571  ;;  %433 = vst [vmem:[#allocation7 + $0x50] sm:$0xff] %v1107_v34  ;;  %v194_v21 = vmul.f32 0.3989423, %v570_v2  ;;  %v290_v38 = vmul.f32 %v1109_v61, %v814_v36  ;;  %v133_v58 = vmul.f32 -0.5, %v117_v16  ;;  %v213_v54 = vmul.f32 0.70710677, %v117_v16 }
  0x69   :  { %v195_v59 = vmul.f32 0.3989423, %v572_v43  ;;  %v291_v4 = vmul.f32 %v1115_v53, %v827_v41  ;;  %v177_v63 = vmul.f32 1.442695, %v148_v32  ;;  %v118_v11 = vmul.f32 %v568_v40, %v1256_v28  ;;  %v1260_v40 = vld [vmem:[#allocation17_spill] sm:$0xff] }
  0x6a   :  { %v1127_v27 = vmul.f32 %v194_v21, %v1024_v47  ;;  %v149_v7 = vmul.f32 %v133_v58, %v117_v16  ;;  %575 = verf.f32 %v213_v54  ;;  %v379_v56 = vadd.f32 %v363_v57, %v347_v26  ;;  %v1259_v26 = vld [vmem:[#allocation15_spill] sm:$0xff] }
  0x6b   :  { %v1130_v17 = vmul.f32 %v195_v59, %v1036_v6  ;;  %577 = vpow2.f32 %v177_v63  ;;  %v134_v3 = vmul.f32 -0.5, %v118_v11  ;;  %v214_v19 = vmul.f32 0.70710677, %v118_v11 }
  0x6c   :  { %v306_v15 = vadd.f32 %v290_v38, %v1127_v27  ;;  %v179_v37 = vmul.f32 1.442695, %v149_v7  ;;  %v395_v31 = vmul.f32 %v1001_v49, %v1001_v49  ;;  %v348_v50 = vmul.f32 %v1258_v0, %v1257_v23  ;;  %v1262_v38 = vld [vmem:[#allocation20_spill] sm:$0xff]  ;;  %v1265_v0 = vld [vmem:[#allocation25_spill] sm:$0xff] }
  0x6d   :  { %v1138_v47 = vadd.f32 %v291_v4, %v1130_v17  ;;  %v150_v52 = vmul.f32 %v134_v3, %v118_v11  ;;  %579 = verf.f32 %v214_v19  ;;  %v364_v6 = vmul.f32 %v998_v12, %v1259_v26  ;;  %v1261_v12 = vld [vmem:[#allocation18_spill] sm:$0xff] }
  0x6e   :  { %434 = vst [vmem:[#allocation7 + $0x58] sm:$0xff] %v306_v15  ;;  %581 = vpow2.f32 %v179_v37  ;;  %v411_v46 = vsub.f32 %v379_v56, %v395_v31  ;;  %v396_v57 = vmul.f32 %v1006_v29, %v1006_v29  ;;  %v349_v49 = vmul.f32 %v1260_v40, %v1003_v1  ;;  %v1266_v40 = vld [vmem:[#allocation26_spill] sm:$0xff] }
  0x6f   :  { %435 = vst [vmem:[#allocation7 + $0x60] sm:$0xff] %v1138_v47  ;;  %v181_v16 = vmul.f32 1.442695, %v150_v52  ;;  %v380_v2 = vadd.f32 %v364_v6, %v348_v50  ;;  %v365_v32 = vmul.f32 %v1012_v33, %v771_v18  ;;  %v397_v43 = vmul.f32 %v1027_v9, %v1027_v9 }
  0x70   :  { %443 = vst [vmem:[#allocation8 + $0x20] sm:$0xff] %v411_v46  ;;  %v350_v21 = vmul.f32 %v1261_v12, %v1008_v44  ;;  %v366_v29 = vmul.f32 %v1018_v14, %v775_v20  ;;  %v398_v1 = vmul.f32 %v1032_v13, %v1032_v13  ;;  %v351_v58 = vmul.f32 %v1262_v38, %v1042_v60  ;;  %v1263_v20 = vld [vmem:[#allocation22_spill] sm:$0xff] }
  0x71   :  { %v574_v54 = vpop.eup %573  ;;  %583 = vpow2.f32 %v181_v16  ;;  %v412_v59 = vsub.f32 %v380_v2, %v396_v57  ;;  %v381_v18 = vadd.f32 %v365_v32, %v349_v49  ;;  %v367_v33 = vmul.f32 %v1046_v51, %v787_v25  ;;  %v1264_v51 = vld [vmem:[#allocation24_spill] sm:$0xff] }
  0x72   :  { %v244_v9 = vadd.f32 1.0, %v574_v54  ;;  %v382_v4 = vadd.f32 %v366_v29, %v350_v21  ;;  %v399_v44 = vmul.f32 %v1058_v42, %v1058_v42  ;;  %v352_v14 = vmul.f32 %v1263_v20, %v1061_v62 }
  0x73   :  { %444 = vst [vmem:[#allocation8 + $0x28] sm:$0xff] %v412_v59  ;;  %v413_v13 = vsub.f32 %v381_v18, %v397_v43  ;;  %v383_v63 = vadd.f32 %v367_v33, %v351_v58  ;;  %v368_v60 = vmul.f32 %v1083_v39, %v799_v30  ;;  %v400_v11 = vmul.f32 %v1092_v8, %v1092_v8 }
  0x74   :  { %v576_v7 = vpop.eup %575  ;;  %v260_v56 = vmul.f32 0.5, %v244_v9  ;;  %v414_v25 = vsub.f32 %v382_v4, %v398_v1  ;;  %v353_v3 = vmul.f32 %v1264_v51, %v1087_v10  ;;  %v369_v42 = vmul.f32 %v1099_v5, %v812_v35  ;;  %v1269_v9 = vld [vmem:[#allocation29_spill] sm:$0xff] }
  0x75   :  { %v578_v19 = vpop.eup %577  ;;  %v245_v62 = vadd.f32 1.0, %v576_v7  ;;  %445 = vst [vmem:[#allocation8 + $0x30] sm:$0xff] %v413_v13  ;;  %v415_v37 = vsub.f32 %v383_v63, %v399_v44  ;;  %v384_v31 = vadd.f32 %v368_v60, %v352_v14  ;;  %v401_v30 = vmul.f32 %v1107_v34, %v1107_v34 }
  0x76   :  { %v196_v39 = vmul.f32 0.3989423, %v578_v19  ;;  %v292_v8 = vmul.f32 %v260_v56, %v1252_v22  ;;  %446 = vst [vmem:[#allocation8 + $0x38] sm:$0xff] %v414_v25  ;;  %v385_v23 = vadd.f32 %v369_v42, %v353_v3  ;;  %v354_v50 = vmul.f32 %v1265_v0, %v1109_v61 }
  0x77   :  { %v580_v10 = vpop.eup %579  ;;  %v261_v52 = vmul.f32 0.5, %v245_v62  ;;  %447 = vst [vmem:[#allocation8 + $0x40] sm:$0xff] %v415_v37  ;;  %v416_v35 = vsub.f32 %v384_v31, %v400_v11  ;;  %v370_v5 = vmul.f32 %v1127_v27, %v814_v36  ;;  %v402_v26 = vmul.f32 %v306_v15, %v306_v15 }
  0x78   :  { %v582_v6 = vpop.eup %581  ;;  %v276_v46 = vmul.f32 %v196_v39, %v1095_v55  ;;  %v246_v34 = vadd.f32 1.0, %v580_v10  ;;  %v417_v57 = vsub.f32 %v385_v23, %v401_v30  ;;  %v355_v49 = vmul.f32 %v1266_v40, %v1115_v53  ;;  %v1267_v55 = vld [vmem:[#allocation27_spill] sm:$0xff] }
  0x79   :  { %v197_v16 = vmul.f32 0.3989423, %v582_v6  ;;  %v293_v2 = vmul.f32 %v261_v52, %v1255_v48  ;;  %448 = vst [vmem:[#allocation8 + $0x48] sm:$0xff] %v416_v35  ;;  %v386_v61 = vadd.f32 %v370_v5, %v354_v50  ;;  %v371_v32 = vmul.f32 %v1130_v17, %v827_v41  ;;  %v1268_v17 = vld [vmem:[#allocation28_spill] sm:$0xff] }
  0x7a   :  { %v308_v43 = vadd.f32 %v292_v8, %v276_v46  ;;  %v262_v12 = vmul.f32 0.5, %v246_v34  ;;  %449 = vst [vmem:[#allocation8 + $0x50] sm:$0xff] %v417_v57  ;;  %v403_v36 = vmul.f32 %v1138_v47, %v1138_v47  ;;  %v356_v27 = vmul.f32 %v1267_v55, %v260_v56 }
  0x7b   :  { %v584_v15 = vpop.eup %583  ;;  %v277_v21 = vmul.f32 %v197_v16, %v1112_v24  ;;  %v418_v53 = vsub.f32 %v386_v61, %v402_v26  ;;  %v387_v29 = vadd.f32 %v371_v32, %v355_v49  ;;  %v372_v1 = vmul.f32 %v276_v46, %v1252_v22 }
  0x7c   :  { %436 = vst [vmem:[#allocation7 + $0x68] sm:$0xff] %v308_v43  ;;  %v198_v38 = vmul.f32 0.3989423, %v584_v15  ;;  %v294_v58 = vmul.f32 %v262_v12, %v1256_v28  ;;  %v404_v41 = vmul.f32 %v308_v43, %v308_v43  ;;  %v357_v54 = vmul.f32 %v1268_v17, %v261_v52 }
  0x7d   :  { %v309_v59 = vadd.f32 %v293_v2, %v277_v21  ;;  %450 = vst [vmem:[#allocation8 + $0x58] sm:$0xff] %v418_v53  ;;  %v419_v18 = vsub.f32 %v387_v29, %v403_v36  ;;  %v388_v47 = vadd.f32 %v372_v1, %v356_v27  ;;  %v373_v33 = vmul.f32 %v277_v21, %v1255_v48 }
  0x7e   :  { %v278_v24 = vmul.f32 %v198_v38, %v1118_v45  ;;  %v358_v4 = vmul.f32 %v1269_v9, %v262_v12 }
  0x7f   :  { %437 = vst [vmem:[#allocation7 + $0x70] sm:$0xff] %v309_v59  ;;  %451 = vst [vmem:[#allocation8 + $0x60] sm:$0xff] %v419_v18  ;;  %v420_v22 = vsub.f32 %v388_v47, %v404_v41  ;;  %v389_v44 = vadd.f32 %v373_v33, %v357_v54  ;;  %v405_v20 = vmul.f32 %v309_v59, %v309_v59 }
  0x80   :  { %v310_v14 = vadd.f32 %v294_v58, %v278_v24  ;;  %v374_v13 = vmul.f32 %v278_v24, %v1256_v28 }
  0x81   :  { %452 = vst [vmem:[#allocation8 + $0x68] sm:$0xff] %v420_v22  ;;  %v421_v63 = vsub.f32 %v389_v44, %v405_v20 }
  0x82   :  { %438 = vst [vmem:[#allocation7 + $0x78] sm:$0xff] %v310_v14  ;;  %v390_v48 = vadd.f32 %v374_v13, %v358_v4  ;;  %v406_v60 = vmul.f32 %v310_v14, %v310_v14 }
  0x83   :  { %453 = vst [vmem:[#allocation8 + $0x70] sm:$0xff] %v421_v63 }
  0x84   :  { %640 = shalt.err (!%p637_p6)
}
  0x85   :  { %s641_s14 = scalar_lea.hbm %s1223_s2, 2048 }
  0x86   :  { %p642_p7 = scmp.ne.s32.totalorder %s1223_s2, %s641_s14  ;;  %p645_p8 = scmp.lt.u32.totalorder %s641_s14, %s1223_s2 }
  0x88   :  { %p647_p9 = pnand %p645_p8, %p642_p7 }
  0x8a   :  { %650 = shalt.err (!%p647_p9)
}
  0x8b   :  { %464 = dma.vmem_to_hbm [thread:$0]  %s462_s8, 2048, %s1223_s2, [#allocation4]   ;;  %v422_v45 = vsub.f32 %v390_v48, %v406_v60 }
  0x8c   :  { %s651_s21 = scalar_lea.vmem %s472_s10, 2048  ;;  %p656_p11 = scmp.lt.s32.totalorder %s472_s10, %s472_s10 }
  0x8d   :  { %454 = vst [vmem:[#allocation8 + $0x78] sm:$0xff] %v422_v45  ;;  %p652_p10 = scmp.ne.s32.totalorder %s472_s10, %s651_s21  ;;  %p657_p12 = scmp.lt.s32.totalorder %s651_s21, %s651_s21 }
  0x8f   :  { %p658_p13 = por %p657_p12, %p656_p11 }
  0x91   :  { %p659_p0 = pnand %p658_p13, %p652_p10 }
  0x93   :  { %662 = shalt.err (!%p659_p0)
}
  0x94   :  { %s663_s24 = scalar_lea.hbm %s1224_s3, 2048 }
  0x95   :  { %p664_p1 = scmp.ne.s32.totalorder %s1224_s3, %s663_s24  ;;  %p667_p2 = scmp.lt.u32.totalorder %s663_s24, %s1224_s3 }
  0x97   :  { %p669_p3 = pnand %p667_p2, %p664_p1 }
  0x99   :  { %672 = shalt.err (!%p669_p3)
}
  0x9a   :  { %474 = dma.vmem_to_hbm [thread:$0]  %s472_s10, 2048, %s1224_s3, [#allocation9]  }
  0x9b   :  { %677 = dma.done.wait [#allocation4], 2048  }
  0x9c   :  { %678 = vsyncadd [#allocation4], 4294965248 }
  0x9d   :  { %679 = dma.done.wait [#allocation9], 2048  }
  0x9e   :  { %680 = vsyncadd [#allocation9], 4294965248 }
  0x9f   :  { %481 = vsyncpa [#allocation3], 1 }
  0xa0   :  { %482 = vsyncpa [#allocation6], 1 }
  0xa1   :  { %483 = vsyncpa [#allocation4], 1 }
  0xa2   :  { %484 = vsyncpa [#allocation9], 1 }

</bundles_post_ra>
